<compile_context>
chip_gen: v7x
topology: tpu7x:2x2x1
jax: 0.10.0
libtpu: 0.0.40
codegen_flags: <defaults>
</compile_context>

<pallas_src>
import jax
import jax.numpy as jnp
from jax.experimental import pallas as pl
from jax.experimental.pallas import tpu as pltpu


def _tv_kernel(x_ref, h_ref, w_ref):
    # x_ref block: (CT, H, W) in the caller's dtype.
    x = x_ref[...].astype(jnp.float32)

    dh = x[:, 1:, :] - x[:, :-1, :]          # (CT, H-1, W) forward diff along H
    dw = x[:, :, 1:] - x[:, :, :-1]          # (CT, H, W-1) forward diff along W

    # Reduce the leading (image) axis first (elementwise VALU adds across 2D
    # tiles), then collapse the remaining 2D tile once per block.
    h_sum = jnp.sum(jnp.sum(dh * dh, axis=0))
    w_sum = jnp.sum(jnp.sum(dw * dw, axis=0))

    # Per-block partial sums, splatted over a full (1, 8, 128) tile so the
    # store is unmasked and every block's output is independent (parallel-safe).
    h_ref[...] = jnp.full(h_ref.shape, h_sum, dtype=jnp.float32)
    w_ref[...] = jnp.full(w_ref.shape, w_sum, dtype=jnp.float32)


def _largest_divisor_at_most(n, cap):
    cap = max(1, min(int(cap), int(n)))
    for d in range(cap, 0, -1):
        if n % d == 0:
            return d
    return 1


def _padded_image_vmem_bytes(H, W, dtype):
    """Bytes one (H, W) image occupies in VMEM after (sublane, lane) padding."""
    itemsize = jnp.dtype(dtype).itemsize
    if itemsize >= 4:
        sub = 8
    elif itemsize == 2:
        sub = 16
    else:
        sub = 32
    ph = -(-H // sub) * sub
    pw = -(-W // 128) * 128
    return ph * pw * itemsize


def tv_loss(x, tvloss_weight=1.0, target_block_bytes=1 * 1024 * 1024):
    """Pallas TPU implementation of TVLoss.forward (x is NCHW)."""
    B, C, H, W = x.shape
    BC = B * C
    x2 = x.reshape(BC, H, W)                 # leading-dim merge: free, no HBM copy

    itemsize = jnp.dtype(x.dtype).itemsize
    per_image_vmem = _padded_image_vmem_bytes(H, W, x.dtype)
    ct = _largest_divisor_at_most(BC, max(1, target_block_bytes // per_image_vmem))
    num_blocks = BC // ct

    cost = pl.CostEstimate(
        flops=6 * BC * H * W,
        transcendentals=0,
        bytes_accessed=BC * H * W * itemsize + 2 * num_blocks * 8 * 128 * 4,
    )

    h_part, w_part = pl.pallas_call(
        _tv_kernel,
        out_shape=(
            jax.ShapeDtypeStruct((num_blocks, 8, 128), jnp.float32),
            jax.ShapeDtypeStruct((num_blocks, 8, 128), jnp.float32),
        ),
        grid_spec=pltpu.PrefetchScalarGridSpec(
            num_scalar_prefetch=0,
            grid=(num_blocks,),
            in_specs=[
                pl.BlockSpec((ct, H, W), lambda i: (i, 0, 0)),
            ],
            out_specs=[
                pl.BlockSpec((1, 8, 128), lambda i: (i, 0, 0)),
                pl.BlockSpec((1, 8, 128), lambda i: (i, 0, 0)),
            ],
        ),
        compiler_params=pltpu.CompilerParams(
            dimension_semantics=("parallel",),
            vmem_limit_bytes=32 * 1024 * 1024,
        ),
        cost_estimate=cost,
    )(x2)

    h_tv = jnp.sum(h_part[:, 0, 0])
    w_tv = jnp.sum(w_part[:, 0, 0])
    count_h = C * (H - 1) * W
    count_w = C * H * (W - 1)
    return tvloss_weight * 2.0 * (h_tv / count_h + w_tv / count_w) / B


def _tv_loss_ref(x, tvloss_weight=1.0):
    B, C, H, W = x.shape
    count_h = C * (H - 1) * W
    count_w = C * H * (W - 1)
    h_tv = jnp.sum((x[:, :, 1:, :] - x[:, :, : H - 1, :]) ** 2)
    w_tv = jnp.sum((x[:, :, :, 1:] - x[:, :, :, : W - 1]) ** 2)
    return tvloss_weight * 2.0 * (h_tv / count_h + w_tv / count_w) / B


if __name__ == "__main__":
    key = jax.random.PRNGKey(0)
    x = jax.random.normal(key, (2, 4, 16, 16), dtype=jnp.float32)

    out = tv_loss(x, tvloss_weight=1.0)
    out = jax.block_until_ready(out)

    ref = _tv_loss_ref(x, tvloss_weight=1.0)
    assert jnp.allclose(out, ref, rtol=1e-5, atol=1e-5), (out, ref)
    print("KERNEL_OK")
</pallas_src>

<mosaic_0001>
module attributes {stable_mosaic.version = 11 : i64} {
  func.func @_tv_kernel(%arg0: i32, %arg1: memref<8x16x16xf32, #tpu.memory_space<vmem>>, %arg2: memref<1x8x128xf32, #tpu.memory_space<vmem>>, %arg3: memref<1x8x128xf32, #tpu.memory_space<vmem>>) attributes {dimension_semantics = [#tpu.dimension_semantics<parallel>], iteration_bounds = array<i64: 1>, scalar_prefetch = 0 : i64, scratch_operands = 0 : i64, tpu.core_type = #tpu.core_type<tc>, window_params = [{transform_indices = @transform_0, window_bounds = array<i64: 8, 16, 16>}, {transform_indices = @transform_1, window_bounds = array<i64: 1, 8, 128>}, {transform_indices = @transform_2, window_bounds = array<i64: 1, 8, 128>}]} {
    %c0 = arith.constant 0 : index
    %c0_0 = arith.constant 0 : index
    %c0_1 = arith.constant 0 : index
    %0 = vector.load %arg1[%c0, %c0_0, %c0_1] : memref<8x16x16xf32, #tpu.memory_space<vmem>>, vector<8x16x16xf32>
    %1 = vector.extract_strided_slice %0 {offsets = [0, 1, 0], sizes = [8, 15, 16], strides = [1, 1, 1]} : vector<8x16x16xf32> to vector<8x15x16xf32>
    %2 = vector.extract_strided_slice %0 {offsets = [0, 0, 0], sizes = [8, 15, 16], strides = [1, 1, 1]} : vector<8x16x16xf32> to vector<8x15x16xf32>
    %3 = arith.subf %1, %2 : vector<8x15x16xf32>
    %4 = vector.extract_strided_slice %0 {offsets = [0, 0, 1], sizes = [8, 16, 15], strides = [1, 1, 1]} : vector<8x16x16xf32> to vector<8x16x15xf32>
    %5 = vector.extract_strided_slice %0 {offsets = [0, 0, 0], sizes = [8, 16, 15], strides = [1, 1, 1]} : vector<8x16x16xf32> to vector<8x16x15xf32>
    %6 = arith.subf %4, %5 : vector<8x16x15xf32>
    %7 = arith.mulf %3, %3 : vector<8x15x16xf32>
    %cst = arith.constant dense<0.000000e+00> : vector<15x16xf32>
    %8 = vector.multi_reduction <add>, %7, %cst [0] : vector<8x15x16xf32> to vector<15x16xf32>
    %9 = vector.shape_cast %8 : vector<15x16xf32> to vector<1x15x16xf32>
    %cst_2 = arith.constant dense<0.000000e+00> : vector<1xf32>
    %10 = vector.multi_reduction <add>, %9, %cst_2 [1, 2] : vector<1x15x16xf32> to vector<1xf32>
    %11 = vector.shape_cast %10 : vector<1xf32> to vector<1x1x1xf32>
    %12 = vector.extract %11[0, 0, 0] : f32 from vector<1x1x1xf32>
    %13 = arith.mulf %6, %6 : vector<8x16x15xf32>
    %cst_3 = arith.constant dense<0.000000e+00> : vector<16x15xf32>
    %14 = vector.multi_reduction <add>, %13, %cst_3 [0] : vector<8x16x15xf32> to vector<16x15xf32>
    %15 = vector.shape_cast %14 : vector<16x15xf32> to vector<1x16x15xf32>
    %cst_4 = arith.constant dense<0.000000e+00> : vector<1xf32>
    %16 = vector.multi_reduction <add>, %15, %cst_4 [1, 2] : vector<1x16x15xf32> to vector<1xf32>
    %17 = vector.shape_cast %16 : vector<1xf32> to vector<1x1x1xf32>
    %18 = vector.extract %17[0, 0, 0] : f32 from vector<1x1x1xf32>
    %19 = vector.broadcast %12 : f32 to vector<1x8x128xf32>
    %c0_5 = arith.constant 0 : index
    %c0_6 = arith.constant 0 : index
    %c0_7 = arith.constant 0 : index
    %20 = vector.load %arg2[%c0_5, %c0_6, %c0_7] : memref<1x8x128xf32, #tpu.memory_space<vmem>>, vector<1x8x128xf32>
    tpu.vector_store %arg2[%c0_5, %c0_6, %c0_7], %19 {strides = array<i32>} : memref<1x8x128xf32, #tpu.memory_space<vmem>>, vector<1x8x128xf32>,
    %21 = vector.broadcast %18 : f32 to vector<1x8x128xf32>
    %c0_8 = arith.constant 0 : index
    %c0_9 = arith.constant 0 : index
    %c0_10 = arith.constant 0 : index
    %22 = vector.load %arg3[%c0_8, %c0_9, %c0_10] : memref<1x8x128xf32, #tpu.memory_space<vmem>>, vector<1x8x128xf32>
    tpu.vector_store %arg3[%c0_8, %c0_9, %c0_10], %21 {strides = array<i32>} : memref<1x8x128xf32, #tpu.memory_space<vmem>>, vector<1x8x128xf32>,
    return
  }
  func.func @transform_0(%arg0: i32) -> (i32, i32, i32) {
    %c0_i32 = arith.constant 0 : i32
    %c0_i32_0 = arith.constant 0 : i32
    %c0_i32_1 = arith.constant 0 : i32
    return %arg0, %c0_i32, %c0_i32_0 : i32, i32, i32
  }
  func.func @transform_1(%arg0: i32) -> (i32, i32, i32) {
    %c0_i32 = arith.constant 0 : i32
    %c0_i32_0 = arith.constant 0 : i32
    %c0_i32_1 = arith.constant 0 : i32
    return %arg0, %c0_i32, %c0_i32_0 : i32, i32, i32
  }
  func.func @transform_2(%arg0: i32) -> (i32, i32, i32) {
    %c0_i32 = arith.constant 0 : i32
    %c0_i32_0 = arith.constant 0 : i32
    %c0_i32_1 = arith.constant 0 : i32
    return %arg0, %c0_i32, %c0_i32_0 : i32, i32, i32
  }
}

</mosaic_0001>

<bundles_post_ra>
// kernel: tpu_custom_call.1
= control target key start
LH: loop header
LB: loop body
LE: loop exit
PB: predicated region body
PF: predicated region fallthrough
CT: control target
= control target key end

     0   :  { %8 = vsyncpa [#allocation3], 0  ;;  %s639_s0 = inlined_call_operand.hbm [shape: f32[8,16,16], index: 0, kind: input, shape index: {}]   ;;  %s640_s1 = inlined_call_operand.hbm [shape: f32[1,8,128], index: 1, kind: output, shape index: {0}]   ;;  %s641_s2 = inlined_call_operand.hbm [shape: f32[1,8,128], index: 2, kind: output, shape index: {1}]  }
   0x1   :  { %9 = vsyncpa [#allocation4], 0 }
   0x2   :  { %10 = vsyncpa [#allocation7], 0  ;;  %s432_s9 = smov [#allocation2]   ;;  %s360_s13 = scalar_lea.hbm %s639_s0, 2048 }
   0x3   :  { %s16_s10 = sshll.u32 %s432_s9, 4  ;;  %p361_p0 = scmp.ne.s32.totalorder %s639_s0, %s360_s13  ;;  %s17_s10 = int_to_ptr.vmem [resolvable:$true] %s16_s10 }
   0x4   :  { %p364_p1 = scmp.lt.u32.totalorder %s360_s13, %s639_s0 }
   0x6   :  { %p366_p2 = pnand %p364_p1, %p361_p0 }
   0x8   :  { %369 = shalt.err (!%p366_p2)
}
   0x9   :  { %s370_s18 = scalar_lea.vmem %s17_s10, 2048  ;;  %p375_p4 = scmp.lt.s32.totalorder %s17_s10, %s17_s10 }
   0xa   :  { %p371_p3 = scmp.ne.s32.totalorder %s17_s10, %s370_s18  ;;  %p376_p5 = scmp.lt.s32.totalorder %s370_s18, %s370_s18 }
   0xc   :  { %p377_p6 = por %p376_p5, %p375_p4 }
   0xe   :  { %p378_p7 = pnand %p377_p6, %p371_p3 }
  0x10   :  { %381 = shalt.err (!%p378_p7)
}
  0x11   :  { %s433_s19 = smov 128   ;;  %s434_s20 = smov 8  }
  0x12   :  { %22 = dma.hbm_to_vmem [thread:$0]  %s639_s0, 2048, %s17_s10, [#allocation3], %s433_s19, %s433_s19, %s434_s20  }
  0x13   :  { %426 = dma.done.wait [#allocation3], 2048  }
  0x14   :  { %427 = vsyncadd [#allocation3], 4294965248  ;;  %v466_v0 = vld [vmem:[#allocation2 + $0x10] sm:$0xff]  ;;  %v468_v1 = vld [vmem:[#allocation2] sm:$0xff]  ;;  %s435_s23 = smov 1   ;;  %vm58_vm0 = vcmask 1040384  }
  0x15   :  { %119 = vrot.lane.b32.xlu1 %v466_v0, %s435_s23  ;;  %115 = vrot.lane.b32.xlu0 %v468_v1, %s435_s23  ;;  %v472_v2 = vld [vmem:[#allocation2 + $0x18] sm:$0xff]  ;;  %v474_v3 = vld [vmem:[#allocation2 + $0x8] sm:$0xff]  ;;  %v480_v5 = vld [vmem:[#allocation2 + $0x20] sm:$0xff]  ;;  %v62_v16 = vrot.slane %v466_v0, 7  ;;  %v59_v17 = vrot.slane %v468_v1, 7  ;;  %vm195_vm1 = vcmask 130049  }
  0x16   :  { %v478_v4 = vld [vmem:[#allocation2 + $0x28] sm:$0xff]  ;;  %v484_v6 = vld [vmem:[#allocation2 + $0x38] sm:$0xff]  ;;  %v486_v7 = vld [vmem:[#allocation2 + $0x30] sm:$0xff]  ;;  %v63_v18 = vrot.slane %v472_v2, 7  ;;  %v60_v19 = vrot.slane %v474_v3, 7  ;;  %v65_v20 = vrot.slane %v480_v5, 7 }
  0x17   :  { %v490_v8 = vld [vmem:[#allocation2 + $0x48] sm:$0xff]  ;;  %v492_v9 = vld [vmem:[#allocation2 + $0x40] sm:$0xff]  ;;  %v496_v10 = vld [vmem:[#allocation2 + $0x58] sm:$0xff]  ;;  %v101_v21 = vsub.f32 %v466_v0, %v62_v16  ;;  %v99_v22 = vsub.f32 %v468_v1, %v59_v17  ;;  %v66_v24 = vrot.slane %v478_v4, 7  ;;  %v69_v34 = vrot.slane %v484_v6, 7  ;;  %s436_s0 = smov 127  }
  0x18   :  { %v498_v11 = vld [vmem:[#allocation2 + $0x50] sm:$0xff]  ;;  %v502_v12 = vld [vmem:[#allocation2 + $0x68] sm:$0xff]  ;;  %v504_v13 = vld [vmem:[#allocation2 + $0x60] sm:$0xff]  ;;  %v64_v23 = vsel %vm58_vm0, %v62_v16, %v63_v18  ;;  %v61_v25 = vsel %vm58_vm0, %v59_v17, %v60_v19  ;;  %v103_v29 = vsub.f32 %v480_v5, %v65_v20  ;;  %v68_v35 = vrot.slane %v486_v7, 7  ;;  %s437_s24 = smov [#allocation5]  }
  0x19   :  { %121 = vrot.lane.b32.xlu1 %v472_v2, %s435_s23  ;;  %117 = vrot.lane.b32.xlu0 %v474_v3, %s435_s23  ;;  %v508_v14 = vld [vmem:[#allocation2 + $0x78] sm:$0xff]  ;;  %v510_v15 = vld [vmem:[#allocation2 + $0x70] sm:$0xff]  ;;  %v102_v28 = vsub.f32 %v472_v2, %v64_v23  ;;  %v181_v30 = vmul.f32 %v101_v21, %v101_v21  ;;  %v179_v31 = vmul.f32 %v99_v22, %v99_v22  ;;  %vm211_vm2 = vcmask 130048   ;;  %s326_s25 = sshll.u32 %s437_s24, 4  ;;  %s327_s25 = int_to_ptr.vmem [resolvable:$true] %s326_s25 }
  0x1a   :  { %v100_v32 = vsub.f32 %v474_v3, %v61_v25  ;;  %v67_v33 = vsel %vm58_vm0, %v65_v20, %v66_v24  ;;  %v183_v40 = vmul.f32 %v103_v29, %v103_v29  ;;  %v70_v44 = vsel %vm58_vm0, %v68_v35, %v69_v34  ;;  %s382_s27 = scalar_lea.vmem %s327_s25, 128  ;;  %p387_p9 = scmp.lt.s32.totalorder %s327_s25, %s327_s25 }
  0x1b   :  { %v182_v38 = vmul.f32 %v102_v28, %v102_v28  ;;  %v104_v39 = vsub.f32 %v478_v4, %v67_v33  ;;  %v197_v41 = vsel %vm195_vm1, %v181_v30, 0.0  ;;  %v196_v42 = vsel %vm195_vm1, %v179_v31, 0.0  ;;  %p383_p8 = scmp.ne.s32.totalorder %s327_s25, %s382_s27  ;;  %p388_p10 = scmp.lt.s32.totalorder %s382_s27, %s382_s27 }
  0x1c   :  { %v180_v43 = vmul.f32 %v100_v32, %v100_v32  ;;  %v72_v45 = vrot.slane %v490_v8, 7  ;;  %v198_v48 = vadd.f32 %v197_v41, %v196_v42  ;;  %v199_v51 = vsel %vm195_vm1, %v183_v40, 0.0 }
  0x1d   :  { %125 = vrot.lane.b32.xlu1 %v478_v4, %s435_s23  ;;  %123 = vrot.lane.b32.xlu0 %v480_v5, %s435_s23  ;;  %v213_v49 = vsel %vm211_vm2, %v182_v38, 0.0  ;;  %v184_v50 = vmul.f32 %v104_v39, %v104_v39  ;;  %v71_v53 = vrot.slane %v492_v9, 7  ;;  %v105_v58 = vsub.f32 %v486_v7, %v68_v35  ;;  %p389_p11 = por %p388_p10, %p387_p9 }
  0x1e   :  { %v212_v52 = vsel %vm211_vm2, %v180_v43, 0.0  ;;  %v106_v59 = vsub.f32 %v484_v6, %v70_v44  ;;  %vm264_vm3 = vcmask 130056   ;;  %v74_v31 = vrot.slane %v498_v11, 7 }
  0x1f   :  { %v547_v16 = vadd.f32 %v213_v49, %v212_v52  ;;  %v185_v21 = vmul.f32 %v105_v58, %v105_v58  ;;  %vm229_vm4 = vcmask 1046528   ;;  %vm236_vm5 = vcmask 129024   ;;  %p390_p12 = pnand %p389_p11, %p383_p8 }
  0x20   :  { %v558_v22 = vmul.f32 %v106_v59, %v106_v59  ;;  %vm303_vm6 = vcmask 121856  }
  0x21   :  { %129 = vrot.lane.b32.xlu1 %v484_v6, %s435_s23  ;;  %127 = vrot.lane.b32.xlu0 %v486_v7, %s435_s23 }
  0x25   :  { %133 = vrot.lane.b32.xlu1 %v490_v8, %s435_s23  ;;  %131 = vrot.lane.b32.xlu0 %v492_v9, %s435_s23 }
  0x29   :  { %137 = vrot.lane.b32.xlu1 %v496_v10, %s435_s23  ;;  %135 = vrot.lane.b32.xlu0 %v498_v11, %s435_s23 }
  0x2d   :  { %141 = vrot.lane.b32.xlu1 %v502_v12, %s435_s23  ;;  %139 = vrot.lane.b32.xlu0 %v504_v13, %s435_s23 }
  0x31   :  { %145 = vrot.lane.b32.xlu1 %v508_v14, %s435_s23  ;;  %143 = vrot.lane.b32.xlu0 %v510_v15, %s435_s23 }
  0x87   :  { %v120_v26 = vpop.permute.xlu1 %119  ;;  %v116_v27 = vpop.permute.xlu0 %115 }
  0x88   :  { %v165_v54 = vsub.f32 %v466_v0, %v120_v26  ;;  %v163_v55 = vsub.f32 %v468_v1, %v116_v27  ;;  %v550_v0 = vsel %vm211_vm2, %v184_v50, 0.0  ;;  %v552_v1 = vadd.f32 %v199_v51, %v198_v48 }
  0x89   :  { %v107_v27 = vsub.f32 %v492_v9, %v71_v53 }
  0x8a   :  { %v250_v17 = vmul.f32 %v165_v54, %v165_v54  ;;  %v248_v18 = vmul.f32 %v163_v55, %v163_v55  ;;  %v80_v54 = vrot.slane %v510_v15, 7 }
  0x8b   :  { %v122_v36 = vpop.permute.xlu1 %121  ;;  %v118_v37 = vpop.permute.xlu0 %117 }
  0x8c   :  { %v166_v56 = vsub.f32 %v472_v2, %v122_v36  ;;  %v164_v57 = vsub.f32 %v474_v3, %v118_v37  ;;  %v73_v2 = vsel %vm58_vm0, %v71_v53, %v72_v45  ;;  %v75_v3 = vrot.slane %v496_v10, 7 }
  0x8d   :  { %v108_v28 = vsub.f32 %v490_v8, %v73_v2  ;;  %v265_v32 = vsel %vm264_vm3, %v248_v18, 0.0  ;;  %v201_v37 = vsel %vm195_vm1, %v185_v21, 0.0  ;;  %v187_v45 = vmul.f32 %v107_v27, %v107_v27 }
  0x8e   :  { %v251_v19 = vmul.f32 %v166_v56, %v166_v56  ;;  %v109_v2 = vsub.f32 %v498_v11, %v74_v31  ;;  %v216_v27 = vadd.f32 %v550_v0, %v547_v16 }
  0x8f   :  { %v126_v46 = vpop.permute.xlu1 %125  ;;  %v124_v47 = vpop.permute.xlu0 %123  ;;  %v188_v53 = vmul.f32 %v108_v28, %v108_v28 }
  0x90   :  { %v168_v60 = vsub.f32 %v478_v4, %v126_v46  ;;  %v167_v61 = vsub.f32 %v480_v5, %v124_v47  ;;  %v249_v4 = vmul.f32 %v164_v57, %v164_v57  ;;  %v281_v33 = vsel %vm264_vm3, %v251_v19, 0.0 }
  0x91   :  { %v81_v46 = vrot.slane %v508_v14, 7 }
  0x92   :  { %v253_v23 = vmul.f32 %v168_v60, %v168_v60  ;;  %v252_v24 = vmul.f32 %v167_v61, %v167_v61  ;;  %v280_v34 = vsel %vm264_vm3, %v249_v4, 0.0 }
  0x93   :  { %v130_v62 = vpop.permute.xlu1 %129  ;;  %v128_v63 = vpop.permute.xlu0 %127  ;;  %v282_v48 = vadd.f32 %v281_v33, %v280_v34  ;;  %v203_v33 = vsel %vm195_vm1, %v187_v45, 0.0  ;;  %v189_v34 = vmul.f32 %v109_v2, %v109_v2 }
  0x94   :  { %v170_v5 = vsub.f32 %v484_v6, %v130_v62  ;;  %v169_v20 = vsub.f32 %v486_v7, %v128_v63  ;;  %v78_v6 = vrot.slane %v502_v12, 7  ;;  %v266_v7 = vsel %vm264_vm3, %v250_v17, 0.0 }
  0x95   :  { %v268_v38 = vsel %vm264_vm3, %v252_v24, 0.0  ;;  %v267_v47 = vadd.f32 %v266_v7, %v265_v32  ;;  %v76_v63 = vsel %vm58_vm0, %v74_v31, %v75_v3  ;;  %v217_v32 = vsel %vm211_vm2, %v558_v22, 0.0 }
  0x96   :  { %v255_v35 = vmul.f32 %v170_v5, %v170_v5  ;;  %v254_v36 = vmul.f32 %v169_v20, %v169_v20  ;;  %v110_v7 = vsub.f32 %v496_v10, %v76_v63  ;;  %v205_v45 = vsel %vm195_vm1, %v189_v34, 0.0 }
  0x97   :  { %v134_v25 = vpop.permute.xlu1 %133  ;;  %v132_v26 = vpop.permute.xlu0 %131  ;;  %v269_v56 = vadd.f32 %v268_v38, %v267_v47 }
  0x98   :  { %v172_v29 = vsub.f32 %v490_v8, %v134_v25  ;;  %v171_v30 = vsub.f32 %v492_v9, %v132_v26  ;;  %v77_v8 = vrot.slane %v504_v13, 7  ;;  %v283_v9 = vsel %vm264_vm3, %v253_v23, 0.0 }
  0x99   :  { %v285_v49 = vsel %vm264_vm3, %v255_v35, 0.0  ;;  %v270_v50 = vsel %vm264_vm3, %v254_v36, 0.0  ;;  %v284_v55 = vadd.f32 %v283_v9, %v282_v48 }
  0x9a   :  { %v257_v41 = vmul.f32 %v172_v29, %v172_v29  ;;  %v256_v42 = vmul.f32 %v171_v30, %v171_v30  ;;  %v271_v18 = vadd.f32 %v270_v50, %v269_v56  ;;  %v79_v26 = vsel %vm58_vm0, %v77_v8, %v78_v6 }
  0x9b   :  { %v138_v39 = vpop.permute.xlu1 %137  ;;  %v136_v40 = vpop.permute.xlu0 %135  ;;  %v286_v17 = vadd.f32 %v285_v49, %v284_v55  ;;  %v202_v6 = vadd.f32 %v201_v37, %v552_v1  ;;  %v111_v35 = vsub.f32 %v504_v13, %v77_v8  ;;  %v219_v1 = vsel %vm211_vm2, %v188_v53, 0.0 }
  0x9c   :  { %v174_v43 = vsub.f32 %v496_v10, %v138_v39  ;;  %v173_v44 = vsub.f32 %v498_v11, %v136_v40  ;;  %v287_v59 = vsel %vm264_vm3, %v257_v41, 0.0  ;;  %v272_v60 = vsel %vm264_vm3, %v256_v42, 0.0 }
  0x9d   :  { %v288_v21 = vadd.f32 %v287_v59, %v286_v17  ;;  %v273_v23 = vadd.f32 %v272_v60, %v271_v18  ;;  %v112_v10 = vsub.f32 %v502_v12, %v79_v26  ;;  %v218_v40 = vadd.f32 %v217_v32, %v216_v27 }
  0x9e   :  { %v259_v51 = vmul.f32 %v174_v43, %v174_v43  ;;  %v258_v52 = vmul.f32 %v173_v44, %v173_v44  ;;  %v190_v42 = vmul.f32 %v110_v7, %v110_v7  ;;  %v82_v37 = vsel %vm58_vm0, %v80_v54, %v81_v46 }
  0x9f   :  { %v142_v57 = vpop.permute.xlu1 %141  ;;  %v140_v58 = vpop.permute.xlu0 %139  ;;  %v191_v8 = vmul.f32 %v111_v35, %v111_v35  ;;  %v113_v43 = vsub.f32 %v510_v15, %v80_v54  ;;  %v220_v44 = vadd.f32 %v219_v1, %v218_v40  ;;  %v192_v47 = vmul.f32 %v112_v10, %v112_v10 }
  0xa0   :  { %v176_v61 = vsub.f32 %v502_v12, %v142_v57  ;;  %v175_v62 = vsub.f32 %v504_v13, %v140_v58  ;;  %v289_v19 = vsel %vm264_vm3, %v259_v51, 0.0  ;;  %v274_v4 = vsel %vm264_vm3, %v258_v52, 0.0 }
  0xa1   :  { %v290_v30 = vadd.f32 %v289_v19, %v288_v21  ;;  %v275_v31 = vadd.f32 %v274_v4, %v273_v23  ;;  %v204_v13 = vadd.f32 %v203_v33, %v202_v6  ;;  %v114_v12 = vsub.f32 %v508_v14, %v82_v37 }
  0xa2   :  { %v261_v5 = vmul.f32 %v176_v61, %v176_v61  ;;  %v260_v20 = vmul.f32 %v175_v62, %v175_v62  ;;  %v221_v48 = vsel %vm211_vm2, %v190_v42, 0.0  ;;  %v207_v51 = vsel %vm195_vm1, %v191_v8, 0.0 }
  0xa3   :  { %v146_v24 = vpop.permute.xlu1 %145  ;;  %v144_v25 = vpop.permute.xlu0 %143  ;;  %v206_v49 = vadd.f32 %v205_v45, %v204_v13  ;;  %v222_v50 = vadd.f32 %v221_v48, %v220_v44  ;;  %v193_v46 = vmul.f32 %v113_v43, %v113_v43  ;;  %v194_v52 = vmul.f32 %v114_v12, %v114_v12 }
  0xa4   :  { %v291_v3 = vsel %vm264_vm3, %v261_v5, 0.0  ;;  %v276_v11 = vsel %vm264_vm3, %v260_v20, 0.0  ;;  %v178_v28 = vsub.f32 %v508_v14, %v146_v24  ;;  %v177_v29 = vsub.f32 %v510_v15, %v144_v25 }
  0xa5   :  { %v292_v36 = vadd.f32 %v291_v3, %v290_v30  ;;  %v277_v9 = vadd.f32 %v276_v11, %v275_v31  ;;  %v223_v53 = vsel %vm211_vm2, %v192_v47, 0.0  ;;  %v208_v55 = vadd.f32 %v207_v51, %v206_v49 }
  0xa6   :  { %v263_v16 = vmul.f32 %v178_v28, %v178_v28  ;;  %v262_v0 = vmul.f32 %v177_v29, %v177_v29  ;;  %v224_v56 = vadd.f32 %v223_v53, %v222_v50  ;;  %v209_v15 = vsel %vm195_vm1, %v193_v46, 0.0 }
  0xa7   :  { %v225_v54 = vsel %vm211_vm2, %v194_v52, 0.0  ;;  %v210_v57 = vadd.f32 %v209_v15, %v208_v55 }
  0xa8   :  { %v293_v38 = vsel %vm264_vm3, %v263_v16, 0.0  ;;  %v278_v39 = vsel %vm264_vm3, %v262_v0, 0.0  ;;  %v226_v58 = vadd.f32 %v225_v54, %v224_v56 }
  0xa9   :  { %v294_v41 = vadd.f32 %v293_v38, %v292_v36  ;;  %v279_v22 = vadd.f32 %v278_v39, %v277_v9  ;;  %v230_v14 = vrot.slane %v210_v57, 1 }
  0xaa   :  { %v231_v59 = vrot.slane %v226_v58, 1 }
  0xab   :  { %299 = vrot.lane.b32.xlu1 %v294_v41, %s436_s0  ;;  %297 = vrot.lane.b32.xlu0 %v279_v22, %s436_s0 }
  0xac   :  { %v232_v60 = vsel %vm229_vm4, %v230_v14, %v231_v59  ;;  %v237_v62 = vsel %vm236_vm5, %v231_v59, 0.0 }
  0xad   :  { %v235_v61 = vsel %vm211_vm2, %v232_v60, 0.0 }
  0xae   :  { %v238_v63 = vadd.f32 %v237_v62, %v235_v61 }
  0xca   :  { %239 = vadd.xlane.f32.xlu0 %v238_v63 }
 0x11d   :  { %v300_v2 = vpop.permute.xlu1 %299  ;;  %v298_v17 = vpop.permute.xlu0 %297 }
 0x11e   :  { %v305_v18 = vsel %vm303_vm6, %v300_v2, 0.0  ;;  %v304_v19 = vsel %vm303_vm6, %v298_v17, 0.0 }
 0x11f   :  { %v306_v4 = vadd.f32 %v305_v18, %v304_v19 }
 0x121   :  { %307 = vadd.xlane.f32.xlu1 %v306_v4 }
 0x157   :  { %v240_v5 = vpop.xlane.xlu0 %239 }
 0x158   :  { %v241_v20 = vrot.slane %v240_v5, 4 }
 0x15a   :  { %v242_v21 = vadd.f32 %v241_v20, %v240_v5 }
 0x15c   :  { %v243_v23 = vrot.slane %v242_v21, 2 }
 0x15e   :  { %v244_v24 = vadd.f32 %v243_v23, %v242_v21 }
 0x160   :  { %v245_v25 = vrot.slane %v244_v24, 1 }
 0x162   :  { %v246_v26 = vadd.f32 %v245_v25, %v244_v24 }
 0x164   :  { %349 = vpush %v246_v26 }
 0x195   :  { %s350_s26 = spop %349 }
 0x196   :  { %v316_v27 = vstv %s350_s26 }
 0x197   :  { %317 = vst [vmem:[#allocation5] sm:$0xff] %v316_v27 }
 0x198   :  { %393 = shalt.err (!%p390_p12)
}
 0x199   :  { %s394_s30 = scalar_lea.hbm %s640_s1, 128 }
 0x19a   :  { %p395_p13 = scmp.ne.s32.totalorder %s640_s1, %s394_s30  ;;  %p398_p0 = scmp.lt.u32.totalorder %s394_s30, %s640_s1 }
 0x19c   :  { %p400_p1 = pnand %p398_p0, %p395_p13 }
 0x19e   :  { %403 = shalt.err (!%p400_p1)
}
 0x19f   :  { %329 = dma.vmem_to_hbm [thread:$0]  %s327_s25, 128, %s640_s1, [#allocation4]  }
 0x1a0   :  { %s438_s9 = smov [#allocation6]  }
 0x1a1   :  { %s336_s10 = sshll.u32 %s438_s9, 4  ;;  %s337_s10 = int_to_ptr.vmem [resolvable:$true] %s336_s10 }
 0x1a2   :  { %s404_s12 = scalar_lea.vmem %s337_s10, 128  ;;  %p409_p3 = scmp.lt.s32.totalorder %s337_s10, %s337_s10 }
 0x1a3   :  { %p405_p2 = scmp.ne.s32.totalorder %s337_s10, %s404_s12  ;;  %p410_p4 = scmp.lt.s32.totalorder %s404_s12, %s404_s12 }
 0x1a5   :  { %p411_p5 = por %p410_p4, %p409_p3 }
 0x1a7   :  { %p412_p6 = pnand %p411_p5, %p405_p2 }
 0x1ae   :  { %v308_v3 = vpop.xlane.xlu1 %307 }
 0x1af   :  { %v309_v11 = vrot.slane %v308_v3, 4 }
 0x1b1   :  { %v310_v28 = vadd.f32 %v309_v11, %v308_v3 }
 0x1b3   :  { %v311_v29 = vrot.slane %v310_v28, 2 }
 0x1b5   :  { %v312_v30 = vadd.f32 %v311_v29, %v310_v28 }
 0x1b7   :  { %v313_v31 = vrot.slane %v312_v30, 1 }
 0x1b9   :  { %v314_v7 = vadd.f32 %v313_v31, %v312_v30 }
 0x1bb   :  { %351 = vpush %v314_v7 }
 0x1ec   :  { %s352_s11 = spop %351 }
 0x1ed   :  { %v318_v32 = vstv %s352_s11 }
 0x1ee   :  { %319 = vst [vmem:[#allocation6] sm:$0xff] %v318_v32 }
 0x1ef   :  { %415 = shalt.err (!%p412_p6)
}
 0x1f0   :  { %s416_s14 = scalar_lea.hbm %s641_s2, 128 }
 0x1f1   :  { %p417_p7 = scmp.ne.s32.totalorder %s641_s2, %s416_s14  ;;  %p420_p8 = scmp.lt.u32.totalorder %s416_s14, %s641_s2 }
 0x1f3   :  { %p422_p9 = pnand %p420_p8, %p417_p7 }
 0x1f5   :  { %425 = shalt.err (!%p422_p9)
}
 0x1f6   :  { %339 = dma.vmem_to_hbm [thread:$0]  %s337_s10, 128, %s641_s2, [#allocation7]  }
 0x1f7   :  { %428 = dma.done.wait [#allocation4], 128  }
 0x1f8   :  { %429 = vsyncadd [#allocation4], 4294967168 }
 0x1f9   :  { %430 = dma.done.wait [#allocation7], 128  }
 0x1fa   :  { %431 = vsyncadd [#allocation7], 4294967168 }
 0x1fb   :  { %346 = vsyncpa [#allocation3], 1 }
 0x1fc   :  { %347 = vsyncpa [#allocation4], 1 }
 0x1fd   :  { %348 = vsyncpa [#allocation7], 1 }

</bundles_post_ra>
